<compile_context>
chip_gen: v7x
topology: tpu7x:2x2x1
jax: 0.10.0
libtpu: 0.0.40
codegen_flags: <defaults>
</compile_context>

<pallas_src>
import functools

import jax
import jax.numpy as jnp
from jax.experimental import pallas as pl
from jax.experimental.pallas import tpu as pltpu


# ---------------------------------------------------------------------------
# VMEM budgeting helpers
# ---------------------------------------------------------------------------

def _vmem_budget():
    """Returns (budget_bytes_for_our_accounting, vmem_limit_bytes)."""
    cap = 64 * 1024 * 1024  # conservative default = v7x per-TensorCore VMEM
    try:
        info = pltpu.get_tpu_info()
        cap = int(getattr(info, "vmem_capacity_bytes", cap)) or cap
    except Exception:  # pragma: no cover - query not available / no TPU info
        pass
    # ~2/3 of physical for explicitly-accounted buffers (capped), limit above
    # that to leave room for Mosaic-internal scratch.
    budget = min(cap * 2 // 3, 80 * 1024 * 1024)
    limit = min(cap * 7 // 8, budget + 32 * 1024 * 1024)
    return int(budget), int(limit)


def _pick_tile_s(s, c, in_dtype, budget_bytes, max_tile=128 * 1024):
    """Spatial tile size (lanes): VMEM-budget driven, multiple of 128."""
    itemsize = jnp.dtype(in_dtype).itemsize
    pack = max(1, 4 // itemsize)                 # sublane packing (8/16/32 rows)
    c_pad_in = -(-c // (8 * pack)) * (8 * pack)  # class-dim padding of input blk
    c_pad_f32 = -(-c // 8) * 8                   # padding of f32 temporaries
    per_lane = (2 * c_pad_in * itemsize          # double-buffered logits blocks
                + 2 * 8 * 4                      # double-buffered label blocks
                + 5 * c_pad_f32 * 4)             # ~5 live (C, TW) f32 temporaries
    t = budget_bytes // per_lane
    t = max(128, min(int(t), max_tile))
    t = (t // 128) * 128
    s_rounded = -(-s // 128) * 128
    return min(t, max(s_rounded, 128))


def _pick_tile_b(b, c, in_dtype, budget_bytes, max_tile=8192):
    """Row tile size for the 2-D (B, C) kernel: multiple of 8."""
    itemsize = jnp.dtype(in_dtype).itemsize
    c_lanes = -(-c // 128) * 128                 # lane padding of the class dim
    per_row = (2 * c_lanes * itemsize            # double-buffered logits blocks
               + 2 * 128 * 4                     # double-buffered label blocks
               + 5 * c_lanes * 4                 # live f32 temporaries
               + 4 * 128 * 4)                    # loss/count output blocks
    t = budget_bytes // per_row
    t = max(8, min(int(t), max_tile))
    t = (t // 8) * 8
    b_rounded = -(-b // 8) * 8
    return min(t, max(b_rounded, 8))


def _partial_width(tile_s):
    """Widest of {1024,512,256,128} dividing tile_s (tile_s is mult of 128)."""
    for w in (1024, 512, 256, 128):
        if tile_s % w == 0:
            return w
    return 128


# ---------------------------------------------------------------------------
# Shared math helpers
# ---------------------------------------------------------------------------

def _focal_term(omp, gamma):
    g = float(gamma)
    if g == 0.0:
        return jnp.ones_like(omp)
    if g == 1.0:
        return omp
    if g == 2.0:
        return omp * omp
    if g.is_integer():
        return omp ** int(g)                     # lax.integer_pow -> repeated mul
    return jnp.power(omp, g)                     # non-integer gamma: pow path


def _lane_tree_sum(v, out_w):
    """Pairwise-tree sum of a (1, TW) row into (1, out_w) lane chunks."""
    tw = v.shape[1]
    chunks = [v[:, k * out_w:(k + 1) * out_w] for k in range(tw // out_w)]
    while len(chunks) > 1:
        nxt = [chunks[i] + chunks[i + 1] for i in range(0, len(chunks) - 1, 2)]
        if len(chunks) % 2:
            nxt.append(chunks[-1])
        chunks = nxt
    return chunks[0]


def _per_column_loss(logits_ref, labels_ref, alpha_ref, *, gamma, ignore_index,
                     s_total, tile_s):
    """Per-column focal loss for one (C, TW) tile (classes on sublanes).

    Returns (loss, valid), each (1, TW) f32; masked columns are exactly 0.
    """
    x = logits_ref[...].astype(jnp.float32)                  # (C, TW)
    labels = labels_ref[...]                                  # (1, TW) int32
    c, tw = x.shape

    # Global column index masks the ragged tail (no wrapper-side padding).
    col = jax.lax.broadcasted_iota(jnp.int32, (1, tw), 1) + pl.program_id(1) * tile_s
    valid = jnp.logical_and(labels != ignore_index, col < s_total)   # (1, TW)

    # log-softmax over the class (sublane) axis; exactly one full-tile exp.
    m = jnp.max(x, axis=0, keepdims=True)                             # (1, TW)
    shifted = x - m
    e = jnp.exp(shifted)                                              # (C, TW)
    sum_e = jnp.sum(e, axis=0, keepdims=True)                         # (1, TW)
    lse = jnp.log(sum_e)

    # One-hot gather of target logit / exp / alpha (no dynamic per-row gather).
    classes = jax.lax.broadcasted_iota(jnp.int32, (c, tw), 0)
    onehot = (classes == labels).astype(jnp.float32)                  # (C, TW)
    shifted_t = jnp.sum(shifted * onehot, axis=0, keepdims=True)      # (1, TW)
    exp_t = jnp.sum(e * onehot, axis=0, keepdims=True)                # (1, TW)
    alpha_t = jnp.sum(alpha_ref[...] * onehot, axis=0, keepdims=True)

    log_pt = shifted_t - lse
    ce = -alpha_t * log_pt                   # NLLLoss(weight=alpha, 'none')
    pt = exp_t / sum_e                       # reuse exp(shifted): no extra exp
    omp = jnp.maximum(1.0 - pt, 0.0)
    focal = _focal_term(omp, gamma)

    # Keep this a select (NOT a multiply): invalid columns may hold NaN/Inf.
    loss = jnp.where(valid, focal * ce, 0.0)
    return loss, valid.astype(jnp.float32)


# ---------------------------------------------------------------------------
# Kernels
# ---------------------------------------------------------------------------

def _focal_loss_partials_kernel(logits_ref, labels_ref, alpha_ref,
                                loss_ref, count_ref, *, gamma, ignore_index,
                                s_total, tile_s, out_w):
    """Per-(batch, spatial-tile) partial loss sum / valid count, (1, out_w)."""
    loss, valid = _per_column_loss(logits_ref, labels_ref, alpha_ref,
                                   gamma=gamma, ignore_index=ignore_index,
                                   s_total=s_total, tile_s=tile_s)
    loss_ref[...] = _lane_tree_sum(loss, out_w)
    count_ref[...] = _lane_tree_sum(valid, out_w)


def _focal_loss_rowwise_kernel(logits_ref, labels_ref, alpha_ref, loss_ref, *,
                               gamma, ignore_index, s_total, tile_s):
    """Lane-dense per-position loss (reduction='none' path, ndim > 2)."""
    loss, _ = _per_column_loss(logits_ref, labels_ref, alpha_ref,
                               gamma=gamma, ignore_index=ignore_index,
                               s_total=s_total, tile_s=tile_s)
    loss_ref[...] = loss


def _focal_loss_rows_kernel(logits_ref, labels_ref, alpha_ref,
                            loss_ref, count_ref, *, gamma, ignore_index,
                            b_total, tile_b):
    """2-D (rows, C) kernel: classes on lanes, rows on sublanes."""
    x = logits_ref[...].astype(jnp.float32)                  # (TB, C)
    labels = labels_ref[...]                                  # (TB, 1) int32
    tb, c = x.shape

    row = jax.lax.broadcasted_iota(jnp.int32, (tb, 1), 0) + pl.program_id(0) * tile_b
    valid = jnp.logical_and(labels != ignore_index, row < b_total)    # (TB, 1)

    m = jnp.max(x, axis=1, keepdims=True)                             # (TB, 1)
    shifted = x - m
    e = jnp.exp(shifted)
    sum_e = jnp.sum(e, axis=1, keepdims=True)
    lse = jnp.log(sum_e)

    classes = jax.lax.broadcasted_iota(jnp.int32, (tb, c), 1)
    onehot = (classes == labels).astype(jnp.float32)                  # (TB, C)
    shifted_t = jnp.sum(shifted * onehot, axis=1, keepdims=True)      # (TB, 1)
    exp_t = jnp.sum(e * onehot, axis=1, keepdims=True)
    alpha_t = jnp.sum(alpha_ref[...] * onehot, axis=1, keepdims=True)

    log_pt = shifted_t - lse
    ce = -alpha_t * log_pt
    pt = exp_t / sum_e
    omp = jnp.maximum(1.0 - pt, 0.0)
    focal = _focal_term(omp, gamma)

    loss_ref[...] = jnp.where(valid, focal * ce, 0.0)
    count_ref[...] = valid.astype(jnp.float32)


# ---------------------------------------------------------------------------
# Wrapper
# ---------------------------------------------------------------------------

def focal_loss(logits, truelabel, alpha=None, gamma: float = 0.0,
               reduction: str = "mean", ignore_index: int = -100):
    """JAX/Pallas equivalent of FocalLoss.forward."""
    if reduction not in ("mean", "sum", "none"):
        raise ValueError('Reduction must be one of: "mean", "sum", "none".')

    budget, vmem_limit = _vmem_budget()

    # -------------------- 2-D (B, C) classification path --------------------
    if logits.ndim == 2:
        b, c = logits.shape
        labels2 = jnp.reshape(truelabel, (b, 1))
        if labels2.dtype != jnp.int32:
            labels2 = labels2.astype(jnp.int32)
        if alpha is None:
            alpha_row = jnp.ones((1, c), jnp.float32)
        else:
            alpha_row = jnp.asarray(alpha, jnp.float32).reshape(1, c)

        tile_b = _pick_tile_b(b, c, logits.dtype, budget)
        grid = (pl.cdiv(b, tile_b),)
        kernel = functools.partial(
            _focal_loss_rows_kernel, gamma=float(gamma),
            ignore_index=int(ignore_index), b_total=b, tile_b=tile_b)
        loss_rows, valid_rows = pl.pallas_call(
            kernel,
            out_shape=(jax.ShapeDtypeStruct((b, 1), jnp.float32),
                       jax.ShapeDtypeStruct((b, 1), jnp.float32)),
            grid=grid,
            in_specs=[pl.BlockSpec((tile_b, c), lambda i: (i, 0)),
                      pl.BlockSpec((tile_b, 1), lambda i: (i, 0)),
                      pl.BlockSpec((1, c), lambda i: (0, 0))],
            out_specs=(pl.BlockSpec((tile_b, 1), lambda i: (i, 0)),
                       pl.BlockSpec((tile_b, 1), lambda i: (i, 0))),
            compiler_params=pltpu.CompilerParams(
                dimension_semantics=("parallel",),
                vmem_limit_bytes=vmem_limit),
        )(logits, labels2, alpha_row)

        if reduction == "none":
            # TODO(synk): PyTorch 'none' drops ignored rows (data-dependent
            # shape); here ignored rows are returned as 0.
            return loss_rows.reshape(-1)
        total = jnp.sum(loss_rows)
        count = jnp.sum(valid_rows)
        if reduction == "sum":
            return total
        return jnp.where(count > 0, total / jnp.maximum(count, 1.0), 0.0)

    # -------------------- segmentation path (ndim > 2) ----------------------
    n, c = logits.shape[0], logits.shape[1]
    s = 1
    for d in logits.shape[2:]:
        s *= d
    logits3 = jnp.reshape(logits, (n, c, s))           # free reshape (NCHW kept)
    labels3 = jnp.reshape(truelabel, (n, 1, s))
    if labels3.dtype != jnp.int32:
        labels3 = labels3.astype(jnp.int32)

    if alpha is None:
        alpha2 = jnp.ones((c, 1), jnp.float32)
    else:
        alpha2 = jnp.asarray(alpha, jnp.float32).reshape(c, 1)

    tile_s = _pick_tile_s(s, c, logits3.dtype, budget)
    grid = (n, pl.cdiv(s, tile_s))

    in_specs = [
        pl.BlockSpec((None, c, tile_s), lambda i, j: (i, 0, j)),
        pl.BlockSpec((None, 1, tile_s), lambda i, j: (i, 0, j)),
        pl.BlockSpec((c, 1), lambda i, j: (0, 0)),
    ]

    if reduction in ("mean", "sum"):
        out_w = _partial_width(tile_s)
        grid_j = grid[1]
        kernel = functools.partial(
            _focal_loss_partials_kernel, gamma=float(gamma),
            ignore_index=int(ignore_index), s_total=s, tile_s=tile_s,
            out_w=out_w)
        loss_parts, count_parts = pl.pallas_call(
            kernel,
            out_shape=(jax.ShapeDtypeStruct((n, grid_j, out_w), jnp.float32),
                       jax.ShapeDtypeStruct((n, grid_j, out_w), jnp.float32)),
            grid=grid,
            in_specs=in_specs,
            out_specs=(pl.BlockSpec((None, 1, out_w), lambda i, j: (i, j, 0)),
                       pl.BlockSpec((None, 1, out_w), lambda i, j: (i, j, 0))),
            compiler_params=pltpu.CompilerParams(
                dimension_semantics=("parallel", "parallel"),
                vmem_limit_bytes=vmem_limit),
        )(logits3, labels3, alpha2)

        total = jnp.sum(loss_parts)
        count = jnp.sum(count_parts)
        if reduction == "sum":
            return total
        # PyTorch module returns 0.0 when there are no unignored labels; its
        # mean is a plain arithmetic mean over valid rows (divide by count).
        return jnp.where(count > 0, total / jnp.maximum(count, 1.0), 0.0)

    # reduction == "none": lane-dense per-position loss.
    kernel = functools.partial(
        _focal_loss_rowwise_kernel, gamma=float(gamma),
        ignore_index=int(ignore_index), s_total=s, tile_s=tile_s)
    per_elem = pl.pallas_call(
        kernel,
        out_shape=jax.ShapeDtypeStruct((n, 1, s), jnp.float32),
        grid=grid,
        in_specs=in_specs,
        out_specs=pl.BlockSpec((None, 1, tile_s), lambda i, j: (i, 0, j)),
        compiler_params=pltpu.CompilerParams(
            dimension_semantics=("parallel", "parallel"),
            vmem_limit_bytes=vmem_limit),
    )(logits3, labels3, alpha2)
    # TODO(synk): PyTorch 'none' drops ignored rows (data-dependent shape); here
    # we return the full-length per-position loss (flattened N,d1..dK order)
    # with ignored positions set to 0.
    return per_elem.reshape(-1)


# ---------------------------------------------------------------------------
# Pure-JAX reference & self-test
# ---------------------------------------------------------------------------

def _reference_focal_loss(logits, truelabel, alpha, gamma, ignore_index):
    """Pure-JAX reference (mean reduction)."""
    c = logits.shape[1]
    perm = (0,) + tuple(range(2, logits.ndim)) + (1,)
    lg = jnp.transpose(logits, perm).reshape(-1, c).astype(jnp.float32)
    lb = truelabel.reshape(-1)
    valid = lb != ignore_index
    lb_safe = jnp.where(valid, lb, 0)
    log_p = jax.nn.log_softmax(lg, axis=-1)
    log_pt = jnp.take_along_axis(log_p, lb_safe[:, None], axis=-1)[:, 0]
    alpha_t = alpha[lb_safe]
    ce = -alpha_t * log_pt
    pt = jnp.exp(log_pt)
    loss = ((1.0 - pt) ** gamma) * ce
    loss = jnp.where(valid, loss, 0.0)
    return jnp.sum(loss) / jnp.maximum(jnp.sum(valid.astype(jnp.float32)), 1.0)


if __name__ == "__main__":
    key = jax.random.PRNGKey(0)
    k1, k2, k3, k4 = jax.random.split(key, 4)

    B, C, H, W = 2, 4, 16, 16
    gamma = 2.0
    ignore_index = -100

    logits = jax.random.normal(k1, (B, C, H, W), jnp.float32)
    labels = jax.random.randint(k2, (B, H, W), 0, C, jnp.int32)
    labels = labels.at[0, 0, :4].set(ignore_index)      # exercise the mask path
    alpha = jnp.array([0.25, 0.75, 1.0, 0.5], jnp.float32)

    out = focal_loss(logits, labels, alpha=alpha, gamma=gamma,
                     reduction="mean", ignore_index=ignore_index)
    out = jax.block_until_ready(out)
    ref = _reference_focal_loss(logits, labels, alpha, gamma, ignore_index)
    assert jnp.allclose(out, ref, rtol=1e-5, atol=1e-5), (out, ref)

    # 'sum' / 'none' consistency on the 4-D path.
    out_sum = focal_loss(logits, labels, alpha=alpha, gamma=gamma,
                         reduction="sum", ignore_index=ignore_index)
    per_row = focal_loss(logits, labels, alpha=alpha, gamma=gamma,
                         reduction="none", ignore_index=ignore_index)
    jax.block_until_ready((out_sum, per_row))
    n_valid = jnp.sum((labels.reshape(-1) != ignore_index).astype(jnp.float32))
    assert jnp.allclose(out_sum, jnp.sum(per_row), rtol=1e-5, atol=1e-5)
    assert jnp.allclose(out, out_sum / n_valid, rtol=1e-5, atol=1e-5)

    # 2-D (batch, C) classification path (dedicated row-major kernel, no
    # wrapper-side transpose).
    B2 = 16
    logits2d = jax.random.normal(k3, (B2, C), jnp.float32)
    labels2d = jax.random.randint(k4, (B2,), 0, C, jnp.int32)
    labels2d = labels2d.at[3].set(ignore_index)
    out2d = focal_loss(logits2d, labels2d, alpha=alpha, gamma=gamma,
                       reduction="mean", ignore_index=ignore_index)
    out2d = jax.block_until_ready(out2d)
    ref2d = _reference_focal_loss(logits2d, labels2d, alpha, gamma, ignore_index)
    assert jnp.allclose(out2d, ref2d, rtol=1e-5, atol=1e-5), (out2d, ref2d)
    per_row2d = focal_loss(logits2d, labels2d, alpha=alpha, gamma=gamma,
                           reduction="none", ignore_index=ignore_index)
    jax.block_until_ready(per_row2d)
    assert per_row2d.shape == (B2,)

    print("KERNEL_OK")
</pallas_src>

<mosaic_0001>
module attributes {stable_mosaic.version = 11 : i64} {
  func.func @_focal_loss_partials_kernel(%arg0: i32, %arg1: i32, %arg2: memref<1x4x256xf32, #tpu.memory_space<vmem>>, %arg3: memref<1x1x256xi32, #tpu.memory_space<vmem>>, %arg4: memref<4x1xf32, #tpu.memory_space<vmem>>, %arg5: memref<1x1x256xf32, #tpu.memory_space<vmem>>, %arg6: memref<1x1x256xf32, #tpu.memory_space<vmem>>) attributes {dimension_semantics = [#tpu.dimension_semantics<parallel>, #tpu.dimension_semantics<parallel>], iteration_bounds = array<i64: 2, 1>, scalar_prefetch = 0 : i64, scratch_operands = 0 : i64, tpu.core_type = #tpu.core_type<tc>, window_params = [{transform_indices = @transform_0, window_bounds = array<i64: 1, 4, 256>}, {transform_indices = @transform_1, window_bounds = array<i64: 1, 1, 256>}, {pipeline_mode = #tpu.pipeline_mode<synchronous>, transform_indices = @transform_2, window_bounds = array<i64: 4, 1>}, {transform_indices = @transform_3, window_bounds = array<i64: 1, 1, 256>}, {transform_indices = @transform_4, window_bounds = array<i64: 1, 1, 256>}]} {
    %c0 = arith.constant 0 : index
    %c0_0 = arith.constant 0 : index
    %c0_1 = arith.constant 0 : index
    %0 = vector.load %arg2[%c0, %c0_0, %c0_1] : memref<1x4x256xf32, #tpu.memory_space<vmem>>, vector<1x4x256xf32>
    %1 = vector.shape_cast %0 : vector<1x4x256xf32> to vector<4x256xf32>
    %c0_2 = arith.constant 0 : index
    %c0_3 = arith.constant 0 : index
    %c0_4 = arith.constant 0 : index
    %2 = vector.load %arg3[%c0_2, %c0_3, %c0_4] : memref<1x1x256xi32, #tpu.memory_space<vmem>>, vector<1x1x256xi32>
    %3 = vector.shape_cast %2 : vector<1x1x256xi32> to vector<1x256xi32>
    %4 = tpu.iota {dimensions = array<i32: 1>} : vector<1x256xi32>
    %c256_i32 = arith.constant 256 : i32
    %5 = arith.muli %arg1, %c256_i32 : i32
    %6 = vector.broadcast %5 : i32 to vector<1x256xi32>
    %7 = arith.addi %4, %6 : vector<1x256xi32>
    %c-100_i32 = arith.constant -100 : i32
    %8 = vector.broadcast %c-100_i32 : i32 to vector<1x256xi32>
    %9 = arith.cmpi ne, %3, %8 : vector<1x256xi32>
    %c256_i32_5 = arith.constant 256 : i32
    %10 = vector.broadcast %c256_i32_5 : i32 to vector<1x256xi32>
    %11 = arith.cmpi slt, %7, %10 : vector<1x256xi32>
    %12 = arith.andi %9, %11 : vector<1x256xi1>
    %cst = arith.constant dense<0xFF800000> : vector<256xf32>
    %13 = vector.multi_reduction <maximumf>, %1, %cst [0] : vector<4x256xf32> to vector<256xf32>
    %14 = vector.shape_cast %13 : vector<256xf32> to vector<1x256xf32>
    %15 = vector.broadcast %14 : vector<1x256xf32> to vector<4x256xf32>
    %16 = arith.subf %1, %15 : vector<4x256xf32>
    %17 = math.exp %16 : vector<4x256xf32>
    %cst_6 = arith.constant dense<0.000000e+00> : vector<256xf32>
    %18 = vector.multi_reduction <add>, %17, %cst_6 [0] : vector<4x256xf32> to vector<256xf32>
    %19 = vector.shape_cast %18 : vector<256xf32> to vector<1x256xf32>
    %20 = math.log %19 : vector<1x256xf32>
    %21 = tpu.iota {dimensions = array<i32: 0>} : vector<4x256xi32>
    %22 = vector.broadcast %3 : vector<1x256xi32> to vector<4x256xi32>
    %23 = arith.cmpi eq, %21, %22 : vector<4x256xi32>
    %24 = arith.extui %23 : vector<4x256xi1> to vector<4x256xi32>
    %25 = arith.sitofp %24 : vector<4x256xi32> to vector<4x256xf32>
    %26 = arith.mulf %16, %25 : vector<4x256xf32>
    %cst_7 = arith.constant dense<0.000000e+00> : vector<256xf32>
    %27 = vector.multi_reduction <add>, %26, %cst_7 [0] : vector<4x256xf32> to vector<256xf32>
    %28 = vector.shape_cast %27 : vector<256xf32> to vector<1x256xf32>
    %29 = arith.mulf %17, %25 : vector<4x256xf32>
    %cst_8 = arith.constant dense<0.000000e+00> : vector<256xf32>
    %30 = vector.multi_reduction <add>, %29, %cst_8 [0] : vector<4x256xf32> to vector<256xf32>
    %31 = vector.shape_cast %30 : vector<256xf32> to vector<1x256xf32>
    %c0_9 = arith.constant 0 : index
    %c0_10 = arith.constant 0 : index
    %32 = vector.load %arg4[%c0_9, %c0_10] : memref<4x1xf32, #tpu.memory_space<vmem>>, vector<4x1xf32>
    %33 = vector.broadcast %32 : vector<4x1xf32> to vector<4x256xf32>
    %34 = arith.mulf %33, %25 : vector<4x256xf32>
    %cst_11 = arith.constant dense<0.000000e+00> : vector<256xf32>
    %35 = vector.multi_reduction <add>, %34, %cst_11 [0] : vector<4x256xf32> to vector<256xf32>
    %36 = vector.shape_cast %35 : vector<256xf32> to vector<1x256xf32>
    %37 = arith.subf %28, %20 : vector<1x256xf32>
    %cst_12 = arith.constant 0.000000e+00 : f32
    %38 = vector.broadcast %cst_12 : f32 to vector<1x256xf32>
    %39 = arith.subf %38, %36 : vector<1x256xf32>
    %40 = arith.mulf %39, %37 : vector<1x256xf32>
    %41 = arith.divf %31, %19 : vector<1x256xf32>
    %cst_13 = arith.constant 1.000000e+00 : f32
    %42 = vector.broadcast %cst_13 : f32 to vector<1x256xf32>
    %43 = arith.subf %42, %41 : vector<1x256xf32>
    %cst_14 = arith.constant 0.000000e+00 : f32
    %44 = vector.broadcast %cst_14 : f32 to vector<1x256xf32>
    %45 = arith.maximumf %43, %44 : vector<1x256xf32>
    %46 = arith.mulf %45, %45 : vector<1x256xf32>
    %47 = arith.mulf %46, %40 : vector<1x256xf32>
    %cst_15 = arith.constant 0.000000e+00 : f32
    %48 = vector.broadcast %cst_15 : f32 to vector<1x256xf32>
    %49 = arith.select %12, %47, %48 : vector<1x256xi1>, vector<1x256xf32>
    %50 = arith.extui %12 : vector<1x256xi1> to vector<1x256xi32>
    %51 = arith.sitofp %50 : vector<1x256xi32> to vector<1x256xf32>
    %c0_16 = arith.constant 0 : index
    %c0_17 = arith.constant 0 : index
    %c0_18 = arith.constant 0 : index
    %52 = vector.load %arg5[%c0_16, %c0_17, %c0_18] : memref<1x1x256xf32, #tpu.memory_space<vmem>>, vector<1x1x256xf32>
    %53 = vector.shape_cast %52 : vector<1x1x256xf32> to vector<1x256xf32>
    %54 = vector.shape_cast %49 : vector<1x256xf32> to vector<1x1x256xf32>
    tpu.vector_store %arg5[%c0_16, %c0_17, %c0_18], %54 {strides = array<i32>} : memref<1x1x256xf32, #tpu.memory_space<vmem>>, vector<1x1x256xf32>,
    %c0_19 = arith.constant 0 : index
    %c0_20 = arith.constant 0 : index
    %c0_21 = arith.constant 0 : index
    %55 = vector.load %arg6[%c0_19, %c0_20, %c0_21] : memref<1x1x256xf32, #tpu.memory_space<vmem>>, vector<1x1x256xf32>
    %56 = vector.shape_cast %55 : vector<1x1x256xf32> to vector<1x256xf32>
    %57 = vector.shape_cast %51 : vector<1x256xf32> to vector<1x1x256xf32>
    tpu.vector_store %arg6[%c0_19, %c0_20, %c0_21], %57 {strides = array<i32>} : memref<1x1x256xf32, #tpu.memory_space<vmem>>, vector<1x1x256xf32>,
    return
  }
  func.func @transform_0(%arg0: i32, %arg1: i32) -> (i32, i32, i32) {
    %c0_i32 = arith.constant 0 : i32
    %c0_i32_0 = arith.constant 0 : i32
    return %arg0, %c0_i32, %arg1 : i32, i32, i32
  }
  func.func @transform_1(%arg0: i32, %arg1: i32) -> (i32, i32, i32) {
    %c0_i32 = arith.constant 0 : i32
    %c0_i32_0 = arith.constant 0 : i32
    return %arg0, %c0_i32, %arg1 : i32, i32, i32
  }
  func.func @transform_2(%arg0: i32, %arg1: i32) -> (i32, i32) {
    %c0_i32 = arith.constant 0 : i32
    %c0_i32_0 = arith.constant 0 : i32
    %c0_i32_1 = arith.constant 0 : i32
    return %c0_i32, %c0_i32_0 : i32, i32
  }
  func.func @transform_3(%arg0: i32, %arg1: i32) -> (i32, i32, i32) {
    %c0_i32 = arith.constant 0 : i32
    %c0_i32_0 = arith.constant 0 : i32
    return %arg0, %arg1, %c0_i32 : i32, i32, i32
  }
  func.func @transform_4(%arg0: i32, %arg1: i32) -> (i32, i32, i32) {
    %c0_i32 = arith.constant 0 : i32
    %c0_i32_0 = arith.constant 0 : i32
    return %arg0, %arg1, %c0_i32 : i32, i32, i32
  }
}

</mosaic_0001>

<bundles_post_ra>
// kernel: tpu_custom_call.1
= control target key start
LH: loop header
LB: loop body
LE: loop exit
PB: predicated region body
PF: predicated region fallthrough
CT: control target
= control target key end

     0   :  { %10 = vsyncpa [#allocation3], 0  ;;  %s1203_s0 = inlined_call_operand.hbm [shape: f32[2,4,256], index: 0, kind: input, shape index: {}]   ;;  %s1204_s1 = inlined_call_operand.vmem [shape: s32[2,1,256], index: 1, kind: input, shape index: {}]   ;;  %s1205_s2 = inlined_call_operand.vmem [shape: f32[4,1], index: 2, kind: input, shape index: {}]   ;;  %s1206_s3 = inlined_call_operand.hbm [shape: f32[2,1,256], index: 3, kind: output, shape index: {0}]   ;;  %s1207_s4 = inlined_call_operand.hbm [shape: f32[2,1,256], index: 4, kind: output, shape index: {1}]  }
   0x1   :  { %12 = vsyncpa [#allocation3 + $0x1], 0 }
   0x2   :  { %13 = vsyncpa [#allocation4], 0 }
   0x3   :  { %15 = vsyncpa [#allocation4 + $0x1], 0 }
   0x4   :  { %16 = vsyncpa [#allocation7], 0 }
   0x5   :  { %18 = vsyncpa [#allocation7 + $0x1], 0  ;;  %s938_s15 = smov 0   ;;  %s940_s16 = smov 0  }
   0x6   :  { %s942_s17 = smov 0   ;;  %s944_s18 = smov 0  }
   0x7   :  { %s946_s19 = smov 0   ;;  %s948_s20 = smov 0  }
   0x8 LB: > { %s651_s21 = sadd.s32 4294967295, %s904_s20   ;;  %s652_s22 = sadd.s32 4294967294, %s904_s20   ;;  %s904_s20 = sphi %s948_s20, %s24_s20   ;;  %s900_s19 = sphi %s946_s19, %s1227_s19   ;;  %s896_s18 = sphi %s944_s18, %s1226_s18   ;;  %s892_s17 = sphi %s942_s17, %s1225_s17   ;;  %s888_s16 = sphi %s940_s16, %s1224_s16   ;;  %s884_s15 = sphi %s938_s15, %s1223_s15  }
   0x9   : > { %s36_s23 = sadd.s32 1, %s900_s19  ;;  %s45_s24 = sadd.s32 1, %s892_s17 }
   0xa   : > { %p38_p0 = scmp.ge.s32.totalorder %s36_s23, 2  ;;  %p52_p1 = scmp.ne.s32.totalorder %s892_s17, %s888_s16 }
   0xb   : > { %p53_p2 = scmp.eq.s32.totalorder %s904_s20, 0  ;;  %p58_p3 = scmp.ne.s32.totalorder %s888_s16, %s884_s15 }
   0xc   : > { %s1229_s23 = smov (%p38_p0, %s36_s23), 0  ;;  %p59_p5 = scmp.eq.s32.totalorder %s651_s21, 0 }
   0xd   : > { %p979_p4 = por %p53_p2, %p52_p1  ;;  %s40_s26 = ssub.s32 %s900_s19, %s1229_s23 }
   0xe   : > { %p133_p6 = scmp.eq.s32.totalorder %s651_s21, 1  ;;  %p43_p7 = scmp.eq.s32.totalorder %s40_s26, 0 }
   0xf   : > { %p985_p8 = por %p59_p5, %p58_p3  ;;  %p139_p10 = scmp.eq.s32.totalorder %s652_s22, 1 }
  0x10   : > { %p989_p9 = por %p133_p6, %p52_p1  ;;  %p694_p13 = scmp.lt.s32.totalorder %s904_s20, 2 }
  0x11   : > { %s994_s29 = scalar_select %p43_p7, %s892_s17, %s45_s24  }
  0x12   : > { %s1211_s28 = scalar_select %p989_p9, 1, 0 }
  0x13   : > { %p996_p11 = por %p139_p10, %p58_p3  ;;  %s190_s5 = sand.u32 1, %s892_s17  }
  0x14   : > { %s655_s6 = sshll.u32 %s190_s5, 3  ;;  %s674_s7 = sshll.u32 %s900_s19, 7 }
  0x15   : > { %s1212_s30 = scalar_select %p996_p11, 1, 0 }
  0x16   : > { %s1007_s10 = scalar_lea.hbm %s1203_s0, %s674_s7  ;;  %s194_s11 = scalar_lea.vmem [#allocation2], %s655_s6 }
  0x17   : > { %s204_s12 = sshll.u32 %s194_s11, 4  ;;  %p1013_p0 = pnand %p694_p13, %p979_p4  ;;  %s1009_s12 = int_to_ptr.vmem [resolvable:$true] %s204_s12 }
  0x18   : > { %s191_s14 = scalar_lea.sflag [#allocation3], %s190_s5  ;;  %s760_s21 = scalar_lea.hbm %s1007_s10, 128 }
  0x19   : > { %p761_p3 = scmp.ne.s32.totalorder %s1007_s10, %s760_s21  ;;  %p762_p5 = pneg %p1013_p0 }
  0x1a   : > { %s765_s25 = scalar_lea.hbm %s1203_s0, 256  ;;  %p766_p4 = scmp.lt.u32.totalorder %s1007_s10, %s1203_s0 }
  0x1b   : > { %p763_p6 = pnand %p762_p5, %p761_p3  ;;  %p767_p10 = scmp.lt.u32.totalorder %s765_s25, %s760_s21 }
  0x1c   : > { %p769_p12 = scmp.lt.u32.totalorder %s760_s21, %s1007_s10 }
  0x1d   : > { %p764_p7 = pneg %p763_p6  ;;  %p768_p13 = por %p767_p10, %p766_p4 }
  0x1f   : > { %p770_p1 = por %p769_p12, %p768_p13 }
  0x21   : > { %p771_p2 = pnand %p770_p1, %p764_p7 }
  0x23   : > { %774 = shalt.err (!%p771_p2)
}
  0x24   : > { %s775_s5 = scalar_lea.vmem %s1009_s12, 128  ;;  %s906_s7 = smov [#allocation2]  }
  0x25   : > { %p776_p3 = scmp.ne.s32.totalorder %s1009_s12, %s775_s5  ;;  %s780_s8 = sshll.u32 %s906_s7, 4  ;;  %s781_s8 = int_to_ptr.vmem [resolvable:$false] %s780_s8 }
  0x26   : > { %s782_s9 = scalar_lea.vmem %s781_s8, 256  ;;  %p783_p9 = scmp.lt.s32.totalorder %s1009_s12, %s781_s8 }
  0x27   : > { %p778_p6 = pnand %p776_p3, %p762_p5  ;;  %p784_p4 = scmp.lt.s32.totalorder %s782_s9, %s775_s5 }
  0x29   : > { %p779_p11 = pneg %p778_p6  ;;  %p785_p10 = por %p784_p4, %p783_p9 }
  0x2b   : > { %p786_p12 = pnand %p785_p10, %p779_p11 }
  0x2d   : > { %789 = shalt.err (!%p786_p12)
}
  0x2e   : > { %686 = dma.hbm_to_vmem [thread:$0]  (!%p1013_p0), %s1007_s10, 128, %s1009_s12, %s191_s14  }
  0x2f   : > { %p1214_p1 = scmp.lt.s32.totalorder %s904_s20, 3  ;;  %p1215_p2 = scmp.ge.s32.totalorder %s904_s20, 1 }
  0x31   : > { %p222_p5 = pnand %p1215_p2, %p1214_p1 }
  0x32   : > { %s1049_s11 = sand.u32 (!%p222_p5), 1, %s888_s16  }
  0x33   : > { %225 = sbr.rel (%p222_p5) target bundleno = 231 (0xe7), region = 32  ;;  %s659_s21 = sshll.u32 (!%p222_p5), %s1049_s11, 3 }
  0x34   : > { %s228_s22 = scalar_lea.sflag (!%p222_p5), [#allocation3], %s1049_s11  ;;  %s1053_s24 = scalar_lea.vmem (!%p222_p5), [#allocation2], %s659_s21 }
  0x3a   : > { %871 = dma.done.wait (%p985_p8), %s228_s22, 128  }
  0x3b   : > { %873 = vsyncadd (%p985_p8), %s228_s22, 4294967168  ;;  %p271_p9 = scmp.lt.s32.totalorder %s896_s18, 1  ;;  %v297_v0 = vlaneseq  ;;  %v907_v1 = vmov 0   ;;  %v412_v5 = vld [vmem:[%s1205_s2] sm:$0xf]  ;;  %v909_v11 = vmov 0.0  }
  0x3c   : > { %748 = vset.pattern.permute.xlu0 %v907_v1  ;;  %v908_v8 = vmov 1966171168   ;;  %v910_v16 = vmov 1   ;;  %s660_s27 = sshll.u32 %s1049_s11, 1  ;;  %s675_s5 = sshll.u32 %s896_s18, 5  ;;  %v279_v24 = vld [vmem:[%s1053_s24] sm:$0xff] }
  0x3d   : > { %s272_s10 = scalar_select %p271_p9, %s896_s18, 1  ;;  %v298_v2 = vshrl.u32 %v297_v0, 7  ;;  %415 = vperm.xlu0 %748, %v412_v5   ;;  %v295_v9 = vunpack.c.l.s4 %v908_v8  ;;  %v293_v17 = vcombine.low %v910_v16, %v910_v16  ;;  %vm1086_vm5 = vcmp.lt.s32.totalorder %v297_v0, 256 }
  0x3e   : > { %s268_s7 = scalar_lea.vmem [#allocation6], %s660_s27  ;;  %s1101_s21 = scalar_lea.hbm %s1207_s4, %s675_s5  ;;  %v311_v25 = vcombine.high %v279_v24, %v279_v24  ;;  %vm313_vm6 = vcmask 1043456  }
  0x3f   : > { %s662_s12 = sshll.u32 %s272_s10, 1  ;;  %v360_v3 = vsub.s32 0, %v298_v2  ;;  %v364_v4 = vsub.s32 1, %v298_v2  ;;  %v296_v14 = vunpack.c.0.s8 %v295_v9  ;;  %s517_s22 = sshll.u32 %s268_s7, 4  ;;  %s1103_s22 = int_to_ptr.vmem [resolvable:$true] %s517_s22 }
  0x40   : > { %s277_s25 = scalar_lea.vmem %s1204_s1, %s662_s12  ;;  %s485_s24 = scalar_lea.sflag [#allocation7], %s1049_s11 }
  0x41   : > { %v280_v6 = vld [vmem:[%s277_s25] sm:$0x3]  ;;  %v1075_v18 = vsub.s32 %v296_v14, %v298_v2  ;;  %s790_s10 = scalar_lea.vmem %s1103_s22, 32  ;;  %p1220_p11 = scmp.ne.s32.totalorder %s1211_s28, 0 }
  0x42   : > { %v361_v7 = vrot.slane %v280_v6, %v360_v3  ;;  %v365_v10 = vrot.slane %v280_v6, %v364_v4  ;;  %vm288_vm3 = vcmp.ne.s32.totalorder %v280_v6, 4294967196  ;;  %p791_p8 = scmp.ne.s32.totalorder %s1103_s22, %s790_s10  ;;  %s911_s12 = smov [#allocation6]  }
  0x43   : > { %v300_v19 = vrot.slane %v293_v17, %v1075_v18  ;;  %s794_s13 = sshll.u32 %s911_s12, 4  ;;  %s795_s13 = int_to_ptr.vmem [resolvable:$false] %s794_s13 }
  0x44   : > { %vm366_vm0 = vcmp.eq.s32.totalorder %v298_v2, %v361_v7  ;;  %vm367_vm1 = vcmp.eq.s32.totalorder %v298_v2, %v365_v10  ;;  %p792_p0 = pnand %p791_p8, %p1220_p11  ;;  %s796_s14 = scalar_lea.vmem %s795_s13, 64 }
  0x45   : > { %v1067_v12 = vsel %vm366_vm0, 1.0, %v909_v11  ;;  %v1069_v13 = vsel %vm367_vm1, 1.0, %v909_v11  ;;  %v307_v20 = vrot.slane %v300_v19, %v1075_v18  ;;  %p797_p13 = scmp.lt.s32.totalorder %s1103_s22, %s795_s13  ;;  %p798_p3 = scmp.lt.s32.totalorder %s796_s14, %s790_s10 }
  0x46   : > { %v1073_v15 = vcombine.low %v1067_v12, %v1069_v13  ;;  %p793_p7 = pneg %p792_p0 }
  0x47   : > { %vm308_vm2 = vcmp.ne.s32.totalorder %v307_v20, 0  ;;  %p799_p6 = por %p798_p3, %p797_p13 }
  0x48   : > { %vm1079_vm4 = vmand %vm288_vm3, %vm308_vm2 }
  0x49   : > { %v665_v22 = vsel %vm1079_vm4, 1.0, %v909_v11  ;;  %p800_p4 = pnand %p799_p6, %p793_p7 }
  0x4a   : > { %478 = vst.msk [vmem:[%s268_s7] sm:$0x3] %vm1086_vm5, %v665_v22 }
  0x4b   : > { %803 = shalt.err (!%p800_p4)
}
  0x4c   : > { %s804_s25 = scalar_lea.hbm %s1101_s21, 32  ;;  %s808_s7 = scalar_lea.hbm %s1207_s4, 64 }
  0x4d   : > { %p805_p10 = scmp.ne.s32.totalorder %s1101_s21, %s804_s25  ;;  %p809_p2 = scmp.lt.u32.totalorder %s1101_s21, %s1207_s4 }
  0x4e   : > { %p810_p5 = scmp.lt.u32.totalorder %s808_s7, %s804_s25  ;;  %p812_p8 = scmp.lt.u32.totalorder %s804_s25, %s1101_s21 }
  0x4f   : > { %p806_p12 = pnand %p805_p10, %p1220_p11 }
  0x50   : > { %p811_p9 = por %p810_p5, %p809_p2 }
  0x51   : > { %p807_p1 = pneg %p806_p12 }
  0x52   : > { %p813_p0 = por %p812_p8, %p811_p9 }
  0x54   : > { %p814_p7 = pnand %p813_p0, %p807_p1 }
  0x56   : > { %817 = shalt.err (!%p814_p7)
}
  0x57   : > { %680 = dma.vmem_to_hbm [thread:$0]  (%p1220_p11), %s1103_s22, 32, %s1101_s21, %s485_s24   ;;  %v314_v26 = vsel %vm313_vm6, %v279_v24, -inf  ;;  %v321_v27 = vsel %vm313_vm6, %v311_v25, -inf }
  0x58   : > { %v315_v28 = vrot.slane %v314_v26, 4  ;;  %v322_v29 = vrot.slane %v321_v27, 4  ;;  %s261_s21 = scalar_lea.vmem [#allocation5], %s660_s27  ;;  %s1150_s12 = scalar_lea.hbm %s1206_s3, %s675_s5 }
  0x59   : > { %s501_s22 = sshll.u32 %s261_s21, 4  ;;  %s480_s27 = scalar_lea.sflag [#allocation4], %s1049_s11  ;;  %s1152_s22 = int_to_ptr.vmem [resolvable:$true] %s501_s22 }
  0x5a   : > { %v316_v30 = vmax.f32 %v314_v26, %v315_v28  ;;  %v323_v31 = vmax.f32 %v321_v27, %v322_v29  ;;  %s818_s13 = scalar_lea.vmem %s1152_s22, 32  ;;  %s912_s18 = smov [#allocation5]  }
  0x5b   : > { %p819_p13 = scmp.ne.s32.totalorder %s1152_s22, %s818_s13  ;;  %s822_s5 = sshll.u32 %s912_s18, 4  ;;  %s823_s5 = int_to_ptr.vmem [resolvable:$false] %s822_s5 }
  0x5c   : > { %v317_v32 = vrot.slane %v316_v30, 2  ;;  %v324_v33 = vrot.slane %v323_v31, 2  ;;  %s824_s14 = scalar_lea.vmem %s823_s5, 64  ;;  %p825_p4 = scmp.lt.s32.totalorder %s1152_s22, %s823_s5 }
  0x5d   : > { %p820_p3 = pnand %p819_p13, %p1220_p11  ;;  %p826_p10 = scmp.lt.s32.totalorder %s824_s14, %s818_s13 }
  0x5e   : > { %v318_v34 = vmax.f32 %v316_v30, %v317_v32  ;;  %v325_v35 = vmax.f32 %v323_v31, %v324_v33 }
  0x5f   : > { %p821_p6 = pneg %p820_p3  ;;  %p827_p12 = por %p826_p10, %p825_p4 }
  0x60   : > { %v319_v36 = vrot.slane %v318_v34, 1  ;;  %v326_v37 = vrot.slane %v325_v35, 1 }
  0x61   : > { %p828_p1 = pnand %p827_p12, %p821_p6 }
  0x62   : > { %v320_v38 = vmax.f32 %v318_v34, %v319_v36  ;;  %v327_v39 = vmax.f32 %v325_v35, %v326_v37 }
  0x64   : > { %v330_v40 = vcombine.low %v320_v38, %v327_v39 }
  0x66   : > { %v332_v41 = vsub.f32 %v279_v24, %v330_v40 }
  0x68   : > { %v333_v42 = vmul.f32 1.442695, %v332_v41  ;;  %v376_v58 = vmul.f32 %v1073_v15, %v332_v41 }
  0x6a   : > { %750 = vpow2.f32 %v333_v42  ;;  %v378_v63 = vcombine.high %v376_v58, %v376_v58  ;;  %v380_v4 = vsel %vm313_vm6, %v376_v58, 0.0 }
  0x6b   : > { %v381_v9 = vrot.slane %v380_v4, 4 }
  0x6c   : > { %v387_v5 = vsel %vm313_vm6, %v378_v63, 0.0 }
  0x6d   : > { %v388_v10 = vrot.slane %v387_v5, 4 }
  0x6f   : > { %v389_v16 = vadd.f32 %v388_v10, %v387_v5 }
  0x71   : > { %v390_v22 = vrot.slane %v389_v16, 2 }
  0x73   : > { %v391_v30 = vadd.f32 %v390_v22, %v389_v16 }
  0x74   : > { %v751_v43 = vpop.eup %750 }
  0x75   : > { %v336_v44 = vcombine.high %v751_v43, %v751_v43  ;;  %v338_v45 = vsel %vm313_vm6, %v751_v43, 0.0  ;;  %v394_v49 = vmul.f32 %v751_v43, %v1073_v15  ;;  %v382_v15 = vadd.f32 %v381_v9, %v380_v4 }
  0x76   : > { %v339_v47 = vrot.slane %v338_v45, 4  ;;  %v392_v40 = vrot.slane %v391_v30, 1 }
  0x77   : > { %v345_v46 = vsel %vm313_vm6, %v336_v44, 0.0  ;;  %v396_v52 = vcombine.high %v394_v49, %v394_v49  ;;  %v398_v55 = vsel %vm313_vm6, %v394_v49, 0.0  ;;  %v383_v20 = vrot.slane %v382_v15, 2 }
  0x78   : > { %v346_v48 = vrot.slane %v345_v46, 4  ;;  %v340_v50 = vadd.f32 %v339_v47, %v338_v45  ;;  %v399_v60 = vrot.slane %v398_v55, 4 }
  0x79   : > { %v405_v56 = vsel %vm313_vm6, %v396_v52, 0.0  ;;  %v384_v29 = vadd.f32 %v383_v20, %v382_v15 }
  0x7a   : > { %v347_v51 = vadd.f32 %v346_v48, %v345_v46  ;;  %v341_v53 = vrot.slane %v340_v50, 2  ;;  %v406_v61 = vrot.slane %v405_v56, 4  ;;  %v400_v1 = vadd.f32 %v399_v60, %v398_v55 }
  0x7b   : > { %v385_v39 = vrot.slane %v384_v29, 1 }
  0x7c   : > { %v348_v54 = vrot.slane %v347_v51, 2  ;;  %v342_v57 = vadd.f32 %v341_v53, %v340_v50  ;;  %v407_v2 = vadd.f32 %v406_v61, %v405_v56  ;;  %v401_v7 = vrot.slane %v400_v1, 2 }
  0x7d   : > { %v386_v48 = vadd.f32 %v385_v39, %v384_v29 }
  0x7e   : > { %v349_v59 = vadd.f32 %v348_v54, %v347_v51  ;;  %v343_v62 = vrot.slane %v342_v57, 1  ;;  %v408_v8 = vrot.slane %v407_v2, 2  ;;  %v402_v11 = vadd.f32 %v401_v7, %v400_v1 }
  0x80   : > { %v350_v0 = vrot.slane %v349_v59, 1  ;;  %v344_v3 = vadd.f32 %v343_v62, %v342_v57  ;;  %v409_v14 = vadd.f32 %v408_v8, %v407_v2  ;;  %v403_v17 = vrot.slane %v402_v11, 1 }
  0x82   : > { %v351_v6 = vadd.f32 %v350_v0, %v349_v59  ;;  %752 = vrcp.f32 %v344_v3  ;;  %v410_v19 = vrot.slane %v409_v14, 1  ;;  %v404_v26 = vadd.f32 %v403_v17, %v402_v11 }
  0x84   : > { %754 = vrcp.f32 %v351_v6  ;;  %v411_v27 = vadd.f32 %v410_v19, %v409_v14 }
  0x85   : > { %756 = vlog2.f32 %v344_v3 }
  0x86   : > { %758 = vlog2.f32 %v351_v6 }
  0x8c   : > { %v753_v24 = vpop.eup %752 }
  0x8d   : > { %v441_v37 = vmul.f32 %v753_v24, %v404_v26 }
  0x8e   : > { %v755_v28 = vpop.eup %754 }
  0x8f   : > { %v443_v38 = vmul.f32 %v755_v28, %v411_v27  ;;  %v757_v41 = vpop.eup %756  ;;  %v444_v47 = vsub.f32 1.0, %v441_v37 }
  0x90   : > { %v759_v44 = vpop.eup %758  ;;  %v353_v49 = vmul.f32 0.6931472, %v757_v41 }
  0x91   : > { %v355_v50 = vmul.f32 0.6931472, %v759_v44  ;;  %v446_v55 = vmax.f32 %v444_v47, 0.0 }
  0x92   : > { %v434_v59 = vsub.f32 %v386_v48, %v353_v49 }
  0x93   : > { %v448_v63 = vmul.f32 %v446_v55, %v446_v55 }
  0xbc   : > { %v416_v25 = vpop.permute.xlu0 %415 }
  0xbd   : > { %v418_v31 = vmul.f32 %v1067_v12, %v416_v25  ;;  %v419_v32 = vmul.f32 %v1069_v13, %v416_v25  ;;  %v445_v12 = vsub.f32 1.0, %v443_v38  ;;  %v393_v13 = vadd.f32 %v392_v40, %v391_v30 }
  0xbf   : > { %v420_v33 = vsel %vm313_vm6, %v418_v31, 0.0  ;;  %v427_v34 = vsel %vm313_vm6, %v419_v32, 0.0  ;;  %v447_v56 = vmax.f32 %v445_v12, 0.0  ;;  %v435_v60 = vsub.f32 %v393_v13, %v355_v50 }
  0xc0   : > { %v421_v35 = vrot.slane %v420_v33, 4  ;;  %v428_v36 = vrot.slane %v427_v34, 4 }
  0xc1   : > { %v449_v0 = vmul.f32 %v447_v56, %v447_v56 }
  0xc2   : > { %v422_v42 = vadd.f32 %v421_v35, %v420_v33  ;;  %v429_v43 = vadd.f32 %v428_v36, %v427_v34 }
  0xc4   : > { %v423_v45 = vrot.slane %v422_v42, 2  ;;  %v430_v46 = vrot.slane %v429_v43, 2 }
  0xc6   : > { %v424_v51 = vadd.f32 %v423_v45, %v422_v42  ;;  %v431_v52 = vadd.f32 %v430_v46, %v429_v43 }
  0xc8   : > { %v425_v53 = vrot.slane %v424_v51, 1  ;;  %v432_v54 = vrot.slane %v431_v52, 1 }
  0xca   : > { %v426_v57 = vadd.f32 %v425_v53, %v424_v51  ;;  %v433_v58 = vadd.f32 %v432_v54, %v431_v52 }
  0xcc   : > { %v436_v61 = vsub.f32 0.0, %v426_v57  ;;  %v437_v62 = vsub.f32 0.0, %v433_v58 }
  0xce   : > { %v438_v1 = vmul.f32 %v436_v61, %v434_v59  ;;  %v439_v2 = vmul.f32 %v437_v62, %v435_v60 }
  0xd0   : > { %v450_v3 = vmul.f32 %v448_v63, %v438_v1  ;;  %v451_v4 = vmul.f32 %v449_v0, %v439_v2 }
  0xd2   : > { %v454_v5 = vcombine.low %v450_v3, %v451_v4 }
  0xd4   : > { %v461_v6 = vrot.slane %v454_v5, %v1075_v18 }
  0xd6   : > { %v468_v7 = vrot.slane %v461_v6, %v1075_v18 }
  0xd8   : > { %v470_v8 = vsel %vm1079_vm4, %v468_v7, 0.0 }
  0xd9   : > { %477 = vst.msk [vmem:[%s261_s21] sm:$0x3] %vm1086_vm5, %v470_v8 }
  0xda   : > { %831 = shalt.err (!%p828_p1)
}
  0xdb   : > { %s832_s11 = scalar_lea.hbm %s1150_s12, 32  ;;  %s836_s6 = scalar_lea.hbm %s1206_s3, 64 }
  0xdc   : > { %p833_p2 = scmp.ne.s32.totalorder %s1150_s12, %s832_s11  ;;  %p837_p8 = scmp.lt.u32.totalorder %s1150_s12, %s1206_s3 }
  0xdd   : > { %p838_p0 = scmp.lt.u32.totalorder %s836_s6, %s832_s11  ;;  %p840_p13 = scmp.lt.u32.totalorder %s832_s11, %s1150_s12 }
  0xde   : > { %p834_p5 = pnand %p833_p2, %p1220_p11 }
  0xdf   : > { %p839_p7 = por %p838_p0, %p837_p8 }
  0xe0   : > { %p835_p9 = pneg %p834_p5 }
  0xe1   : > { %p841_p3 = por %p840_p13, %p839_p7 }
  0xe3   : > { %p842_p6 = pnand %p841_p3, %p835_p9 }
  0xe5   : > { %845 = shalt.err (!%p842_p6)
}
  0xe6   : > { %679 = dma.vmem_to_hbm [thread:$0]  (%p1220_p11), %s1152_s22, 32, %s1150_s12, %s480_s27  }
  0xe7 PF: > { %s529_s9 = sand.u32 1, %s884_s15   ;;  %p1221_p4 = scmp.ne.s32.totalorder %s1212_s30, 0 }
  0xe8   : > { %p1222_p10 = scmp.ge.s32.totalorder %s904_s20, 2  ;;  %s530_s21 = scalar_lea.sflag [#allocation4], %s529_s9 }
  0xea   : > { %p688_p12 = pnand %p1222_p10, %p1221_p4 }
  0xec   : > { %875 = dma.done.wait (!%p688_p12), %s530_s21, 32  }
  0xed   : > { %877 = vsyncadd (!%p688_p12), %s530_s21, 4294967264  ;;  %s539_s24 = scalar_lea.sflag [#allocation7], %s529_s9 }
  0xee   : > { %879 = dma.done.wait (!%p688_p12), %s539_s24, 32  }
  0xef   : > { %881 = vsyncadd (!%p688_p12), %s539_s24, 4294967264  ;;  %s24_s20 = sadd.s32 1, %s904_s20   ;;  %s1223_s15 = smov %s888_s16 }
  0xf0   : > { %p21_p1 = scmp.ge.s32.totalorder %s24_s20, 4   ;;  %s1224_s16 = smov %s892_s17 }
  0xf1   : > { %s1225_s17 = smov %s994_s29  ;;  %s1226_s18 = smov %s900_s19 }
  0xf2   : > { %s1227_s19 = smov %s1229_s23  ;;  %23 = sbr.rel (!%p21_p1) target bundleno = 8 (0x8), region = 97 }
  0xf9   :  { %544 = vsyncpa [#allocation3], 1 }
  0xfa   :  { %546 = vsyncpa [#allocation3 + $0x1], 1 }
  0xfb   :  { %547 = vsyncpa [#allocation4], 1 }
  0xfc   :  { %549 = vsyncpa [#allocation4 + $0x1], 1 }
  0xfd   :  { %550 = vsyncpa [#allocation7], 1 }
  0xfe   :  { %552 = vsyncpa [#allocation7 + $0x1], 1 }

</bundles_post_ra>
